<compile_context>
chip_gen: v6e
topology: v6e:2x2x1
jax: 0.10.0
libtpu: 0.0.40
codegen_flags: <defaults>
</compile_context>

<pallas_src>
import jax
import jax.numpy as jnp
from jax.experimental import pallas as pl
from jax.experimental.pallas import tpu as pltpu

_LANES = 128


def _epe_kernel(flow_ref, gt_ref, mask_ref, out_ref):
    # flow_ref / gt_ref : (1, C, block_rows, 128)
    # mask_ref / out_ref: (1, block_rows, 128)
    C = flow_ref.shape[1]

    # Unrolled channel reduction: each channel slice is a dense (rows, 128)
    # tile, so this is pure element-wise VPU work.  Upcast to f32 before the
    # subtract so bf16 inputs stay close to an f32 reference.
    acc = None
    for c in range(C):
        d = flow_ref[0, c].astype(jnp.float32) - gt_ref[0, c].astype(jnp.float32)
        sq = d * d
        acc = sq if acc is None else acc + sq

    loss_map = jnp.sqrt(acc + 1e-6)
    mask = mask_ref[0].astype(jnp.float32)
    out_ref[0] = (loss_map * mask).astype(out_ref.dtype)


def _round_up(x, m):
    return -(-x // m) * m


def _vmem_limit_bytes():
    """Generation-aware scoped-VMEM limit (conservative fallback: v7x 64 MiB)."""
    cap = None
    try:
        info = pltpu.get_tpu_info()
        cap = getattr(info, "vmem_capacity_bytes", None)
    except Exception:
        cap = None
    if not cap:
        cap = 64 << 20
    return int(min((cap * 3) // 4, 64 << 20))


def _pick_block_rows(rows, n_batch, C, in_item, mask_item, out_item,
                     vmem_limit, target_block_rows):
    # VMEM bytes needed per single 128-lane row of the block:
    #   double-buffered pipeline copies of flow/gt/mask/out + ~3 f32 temps.
    per_row = 2 * (2 * C * _LANES * in_item + _LANES * mask_item + _LANES * out_item)
    per_row += 3 * _LANES * 4
    budget = (vmem_limit * 3) // 4
    cap = max(8, (budget // per_row) // 8 * 8)
    cap = min(cap, _round_up(max(target_block_rows, 8), 8))

    if rows <= cap:
        # Whole spatial extent fits in one block per batch item (block equals
        # the full dim, so no 8-sublane divisibility needed).  If there is no
        # batch parallelism, split into two blocks so both v7x TensorCores
        # get work.
        if n_batch == 1 and rows >= 16:
            half = _round_up(pl.cdiv(rows, 2), 8)
            if half < rows:
                return half
        return rows
    # Multiple spatial blocks: block must be a multiple of 8.  Pallas clips
    # the (possibly partial) last block, so `rows` is never padded.
    return cap


def epe_loss(flow, gt, loss_mask, *, target_block_rows=2048):
    """flow, gt: (N, C, H, W); loss_mask: (N, 1, H, W) -> (N, 1, H, W)."""
    N, C, H, W = flow.shape
    HW = H * W

    # Keep the mask in a float dtype the TPU tiles cleanly (bool/int8 packs
    # 32 sublanes per tile and small blocks would hit layout constraints).
    if not jnp.issubdtype(loss_mask.dtype, jnp.floating):
        loss_mask = loss_mask.astype(jnp.float32)

    out_dtype = flow.dtype
    in_item = jnp.dtype(flow.dtype).itemsize
    mask_item = jnp.dtype(loss_mask.dtype).itemsize
    out_item = jnp.dtype(out_dtype).itemsize

    rows = pl.cdiv(HW, _LANES)
    lane_pad = rows * _LANES - HW

    # Dense (rows, 128) view of the flattened spatial axis.  When HW % 128
    # == 0 these reshapes are contiguous and free (no extra HBM traffic).
    flow_f = flow.reshape(N, C, HW)
    gt_f = gt.reshape(N, C, HW)
    mask_f = loss_mask.reshape(N, HW)
    if lane_pad:
        # TODO(synk): the ragged-lane tail (HW % 128 != 0) still pays one
        # padded input copy + one output slice; an element-offset BlockSpec
        # with a masked in-kernel tail store would remove it.
        flow_f = jnp.pad(flow_f, ((0, 0), (0, 0), (0, lane_pad)))
        gt_f = jnp.pad(gt_f, ((0, 0), (0, 0), (0, lane_pad)))
        mask_f = jnp.pad(mask_f, ((0, 0), (0, lane_pad)))

    flow_t = flow_f.reshape(N, C, rows, _LANES)
    gt_t = gt_f.reshape(N, C, rows, _LANES)
    mask_t = mask_f.reshape(N, rows, _LANES)

    vmem_limit = _vmem_limit_bytes()
    block_rows = _pick_block_rows(rows, N, C, in_item, mask_item, out_item,
                                  vmem_limit, target_block_rows)
    num_spatial_blocks = pl.cdiv(rows, block_rows)

    cost = pl.CostEstimate(
        flops=N * HW * (3 * C + 2),          # per-channel sub/mul/add + eps add + mask mul
        transcendentals=N * HW,              # one sqrt per output element
        bytes_accessed=N * rows * _LANES * (2 * C * in_item + mask_item + out_item),
    )

    out = pl.pallas_call(
        _epe_kernel,
        out_shape=jax.ShapeDtypeStruct((N, rows, _LANES), out_dtype),
        grid_spec=pltpu.PrefetchScalarGridSpec(
            num_scalar_prefetch=0,
            grid=(N, num_spatial_blocks),
            in_specs=[
                pl.BlockSpec((1, C, block_rows, _LANES),
                             lambda n, s: (n, 0, s, 0)),
                pl.BlockSpec((1, C, block_rows, _LANES),
                             lambda n, s: (n, 0, s, 0)),
                pl.BlockSpec((1, block_rows, _LANES),
                             lambda n, s: (n, s, 0)),
            ],
            out_specs=pl.BlockSpec((1, block_rows, _LANES),
                                   lambda n, s: (n, s, 0)),
        ),
        compiler_params=pltpu.CompilerParams(
            dimension_semantics=("parallel", "parallel"),
            vmem_limit_bytes=vmem_limit,
        ),
        cost_estimate=cost,
    )(flow_t, gt_t, mask_t)

    if lane_pad:
        out = out.reshape(N, rows * _LANES)[:, :HW]
    return out.reshape(N, 1, H, W)


if __name__ == "__main__":
    key = jax.random.PRNGKey(0)
    k1, k2, k3 = jax.random.split(key, 3)

    N, C, H, W = 2, 4, 16, 16
    flow = jax.random.normal(k1, (N, C, H, W), dtype=jnp.float32)
    gt = jax.random.normal(k2, (N, C, H, W), dtype=jnp.float32)
    loss_mask = (jax.random.uniform(k3, (N, 1, H, W)) > 0.5).astype(jnp.float32)

    out = epe_loss(flow, gt, loss_mask)
    jax.block_until_ready(out)

    # Pure-JAX reference check.
    ref = jnp.sqrt(jnp.sum((flow - gt) ** 2, axis=1, keepdims=True) + 1e-6) * loss_mask
    assert out.shape == (N, 1, H, W)
    assert jnp.allclose(out, ref, atol=1e-5, rtol=1e-5)

    print("KERNEL_OK")
</pallas_src>

<mosaic_0001>
module attributes {stable_mosaic.version = 11 : i64} {
  func.func @_epe_kernel(%arg0: i32, %arg1: i32, %arg2: memref<1x4x2x128xf32, #tpu.memory_space<vmem>>, %arg3: memref<1x4x2x128xf32, #tpu.memory_space<vmem>>, %arg4: memref<1x2x128xf32, #tpu.memory_space<vmem>>, %arg5: memref<1x2x128xf32, #tpu.memory_space<vmem>>) attributes {dimension_semantics = [#tpu.dimension_semantics<parallel>, #tpu.dimension_semantics<parallel>], iteration_bounds = array<i64: 2, 1>, scalar_prefetch = 0 : i64, scratch_operands = 0 : i64, tpu.core_type = #tpu.core_type<tc>, window_params = [{transform_indices = @transform_0, window_bounds = array<i64: 1, 4, 2, 128>}, {transform_indices = @transform_1, window_bounds = array<i64: 1, 4, 2, 128>}, {transform_indices = @transform_2, window_bounds = array<i64: 1, 2, 128>}, {transform_indices = @transform_3, window_bounds = array<i64: 1, 2, 128>}]} {
    %c0 = arith.constant 0 : index
    %c0_0 = arith.constant 0 : index
    %c0_1 = arith.constant 0 : index
    %c0_2 = arith.constant 0 : index
    %0 = vector.load %arg2[%c0, %c0_0, %c0_1, %c0_2] : memref<1x4x2x128xf32, #tpu.memory_space<vmem>>, vector<1x1x2x128xf32>
    %1 = vector.shape_cast %0 : vector<1x1x2x128xf32> to vector<2x128xf32>
    %c0_3 = arith.constant 0 : index
    %c0_4 = arith.constant 0 : index
    %c0_5 = arith.constant 0 : index
    %c0_6 = arith.constant 0 : index
    %2 = vector.load %arg3[%c0_3, %c0_4, %c0_5, %c0_6] : memref<1x4x2x128xf32, #tpu.memory_space<vmem>>, vector<1x1x2x128xf32>
    %3 = vector.shape_cast %2 : vector<1x1x2x128xf32> to vector<2x128xf32>
    %4 = arith.subf %1, %3 : vector<2x128xf32>
    %5 = arith.mulf %4, %4 : vector<2x128xf32>
    %c0_7 = arith.constant 0 : index
    %c1 = arith.constant 1 : index
    %c0_8 = arith.constant 0 : index
    %c0_9 = arith.constant 0 : index
    %6 = vector.load %arg2[%c0_7, %c1, %c0_8, %c0_9] : memref<1x4x2x128xf32, #tpu.memory_space<vmem>>, vector<1x1x2x128xf32>
    %7 = vector.shape_cast %6 : vector<1x1x2x128xf32> to vector<2x128xf32>
    %c0_10 = arith.constant 0 : index
    %c1_11 = arith.constant 1 : index
    %c0_12 = arith.constant 0 : index
    %c0_13 = arith.constant 0 : index
    %8 = vector.load %arg3[%c0_10, %c1_11, %c0_12, %c0_13] : memref<1x4x2x128xf32, #tpu.memory_space<vmem>>, vector<1x1x2x128xf32>
    %9 = vector.shape_cast %8 : vector<1x1x2x128xf32> to vector<2x128xf32>
    %10 = arith.subf %7, %9 : vector<2x128xf32>
    %11 = arith.mulf %10, %10 : vector<2x128xf32>
    %12 = arith.addf %5, %11 : vector<2x128xf32>
    %c0_14 = arith.constant 0 : index
    %c2 = arith.constant 2 : index
    %c0_15 = arith.constant 0 : index
    %c0_16 = arith.constant 0 : index
    %13 = vector.load %arg2[%c0_14, %c2, %c0_15, %c0_16] : memref<1x4x2x128xf32, #tpu.memory_space<vmem>>, vector<1x1x2x128xf32>
    %14 = vector.shape_cast %13 : vector<1x1x2x128xf32> to vector<2x128xf32>
    %c0_17 = arith.constant 0 : index
    %c2_18 = arith.constant 2 : index
    %c0_19 = arith.constant 0 : index
    %c0_20 = arith.constant 0 : index
    %15 = vector.load %arg3[%c0_17, %c2_18, %c0_19, %c0_20] : memref<1x4x2x128xf32, #tpu.memory_space<vmem>>, vector<1x1x2x128xf32>
    %16 = vector.shape_cast %15 : vector<1x1x2x128xf32> to vector<2x128xf32>
    %17 = arith.subf %14, %16 : vector<2x128xf32>
    %18 = arith.mulf %17, %17 : vector<2x128xf32>
    %19 = arith.addf %12, %18 : vector<2x128xf32>
    %c0_21 = arith.constant 0 : index
    %c3 = arith.constant 3 : index
    %c0_22 = arith.constant 0 : index
    %c0_23 = arith.constant 0 : index
    %20 = vector.load %arg2[%c0_21, %c3, %c0_22, %c0_23] : memref<1x4x2x128xf32, #tpu.memory_space<vmem>>, vector<1x1x2x128xf32>
    %21 = vector.shape_cast %20 : vector<1x1x2x128xf32> to vector<2x128xf32>
    %c0_24 = arith.constant 0 : index
    %c3_25 = arith.constant 3 : index
    %c0_26 = arith.constant 0 : index
    %c0_27 = arith.constant 0 : index
    %22 = vector.load %arg3[%c0_24, %c3_25, %c0_26, %c0_27] : memref<1x4x2x128xf32, #tpu.memory_space<vmem>>, vector<1x1x2x128xf32>
    %23 = vector.shape_cast %22 : vector<1x1x2x128xf32> to vector<2x128xf32>
    %24 = arith.subf %21, %23 : vector<2x128xf32>
    %25 = arith.mulf %24, %24 : vector<2x128xf32>
    %26 = arith.addf %19, %25 : vector<2x128xf32>
    %cst = arith.constant 9.99999997E-7 : f32
    %27 = vector.broadcast %cst : f32 to vector<2x128xf32>
    %28 = arith.addf %26, %27 : vector<2x128xf32>
    %29 = math.sqrt %28 : vector<2x128xf32>
    %c0_28 = arith.constant 0 : index
    %c0_29 = arith.constant 0 : index
    %c0_30 = arith.constant 0 : index
    %30 = vector.load %arg4[%c0_28, %c0_29, %c0_30] : memref<1x2x128xf32, #tpu.memory_space<vmem>>, vector<1x2x128xf32>
    %31 = vector.shape_cast %30 : vector<1x2x128xf32> to vector<2x128xf32>
    %32 = arith.mulf %29, %31 : vector<2x128xf32>
    %c0_31 = arith.constant 0 : index
    %c0_32 = arith.constant 0 : index
    %c0_33 = arith.constant 0 : index
    %33 = vector.load %arg5[%c0_31, %c0_32, %c0_33] : memref<1x2x128xf32, #tpu.memory_space<vmem>>, vector<1x2x128xf32>
    %34 = vector.shape_cast %33 : vector<1x2x128xf32> to vector<2x128xf32>
    %35 = vector.shape_cast %32 : vector<2x128xf32> to vector<1x2x128xf32>
    tpu.vector_store %arg5[%c0_31, %c0_32, %c0_33], %35 {strides = array<i32>} : memref<1x2x128xf32, #tpu.memory_space<vmem>>, vector<1x2x128xf32>,
    return
  }
  func.func @transform_0(%arg0: i32, %arg1: i32) -> (i32, i32, i32, i32) {
    %c0_i32 = arith.constant 0 : i32
    %c0_i32_0 = arith.constant 0 : i32
    %c0_i32_1 = arith.constant 0 : i32
    return %arg0, %c0_i32, %arg1, %c0_i32_0 : i32, i32, i32, i32
  }
  func.func @transform_1(%arg0: i32, %arg1: i32) -> (i32, i32, i32, i32) {
    %c0_i32 = arith.constant 0 : i32
    %c0_i32_0 = arith.constant 0 : i32
    %c0_i32_1 = arith.constant 0 : i32
    return %arg0, %c0_i32, %arg1, %c0_i32_0 : i32, i32, i32, i32
  }
  func.func @transform_2(%arg0: i32, %arg1: i32) -> (i32, i32, i32) {
    %c0_i32 = arith.constant 0 : i32
    %c0_i32_0 = arith.constant 0 : i32
    return %arg0, %arg1, %c0_i32 : i32, i32, i32
  }
  func.func @transform_3(%arg0: i32, %arg1: i32) -> (i32, i32, i32) {
    %c0_i32 = arith.constant 0 : i32
    %c0_i32_0 = arith.constant 0 : i32
    return %arg0, %arg1, %c0_i32 : i32, i32, i32
  }
}

</mosaic_0001>

<bundles_post_ra>
// kernel: tpu_custom_call.1
= control target key start
LH: loop header
LB: loop body
LE: loop exit
PB: predicated region body
PF: predicated region fallthrough
CT: control target
= control target key end

     0   :  { %s953_s0 = inlined_call_operand.hbm [shape: f32[2,4,2,128], index: 0, kind: input, shape index: {}]   ;;  %s954_s1 = inlined_call_operand.hbm [shape: f32[2,4,2,128], index: 1, kind: input, shape index: {}]   ;;  %s955_s2 = inlined_call_operand.hbm [shape: f32[2,2,128], index: 2, kind: input, shape index: {}]   ;;  %s956_s3 = inlined_call_operand.hbm [shape: f32[2,2,128], index: 3, kind: output, shape index: {}]  }
   0x1   :  { %959 = sst [smem:[#allocation15_spill]] %s954_s1 }
   0x2   :  { %8 = vsyncpa [#allocation3], 0 }
   0x3   :  { %10 = vsyncpa [#allocation3 + $0x1], 0 }
   0x4   :  { %11 = vsyncpa [#allocation6], 0 }
   0x5   :  { %13 = vsyncpa [#allocation6 + $0x1], 0 }
   0x6   :  { %14 = vsyncpa [#allocation4], 0 }
   0x7   :  { %16 = vsyncpa [#allocation4 + $0x1], 0  ;;  %s765_s12 = smov 0   ;;  %s767_s13 = smov 0  }
   0x8   :  { %s769_s14 = smov 0   ;;  %s771_s15 = smov 0  }
   0x9   :  { %s773_s16 = smov 0   ;;  %s775_s17 = smov 0  }
   0xa LB: > { %960 = sst [smem:[#allocation12_spill]] %s725_s14  ;;  %s796_s18 = sadd.s32 4294967295, %s737_s17   ;;  %s737_s17 = sphi %s775_s17, %s22_s17   ;;  %s733_s16 = sphi %s773_s16, %s977_s16   ;;  %s729_s15 = sphi %s771_s15, %s976_s15   ;;  %s725_s14 = sphi %s769_s14, %s972_s14   ;;  %s721_s13 = sphi %s767_s13, %s975_s13   ;;  %s717_s12 = sphi %s765_s12, %s974_s12  }
   0xb   : > { %s465_s19 = sadd.s32 4294967294, %s737_s17   ;;  %s34_s20 = sadd.s32 1, %s733_s16 }
   0xc   : > { %s43_s21 = sadd.s32 1, %s725_s14  ;;  %p36_p0 = scmp.ge.s32.totalorder %s34_s20, 2 }
   0xd   : > { %p50_p1 = scmp.ne.s32.totalorder %s725_s14, %s721_s13  ;;  %p51_p2 = scmp.eq.s32.totalorder %s737_s17, 0 }
   0xe   : > { %p56_p3 = scmp.ne.s32.totalorder %s721_s13, %s717_s12  ;;  %s979_s20 = smov (%p36_p0, %s34_s20), 0 }
   0xf   : > { %961 = sst [smem:[#allocation13_spill]] %s979_s20  ;;  %p808_p4 = por %p51_p2, %p50_p1 }
  0x10   : > { %p57_p5 = scmp.eq.s32.totalorder %s796_s18, 0  ;;  %s38_s23 = ssub.s32 %s733_s16, %s979_s20 }
  0x11   : > { %p138_p6 = scmp.eq.s32.totalorder %s796_s18, 1  ;;  %p41_p7 = scmp.eq.s32.totalorder %s38_s23, 0 }
  0x12   : > { %p816_p8 = por %p57_p5, %p56_p3  ;;  %p144_p10 = scmp.eq.s32.totalorder %s465_s19, 1 }
  0x13   : > { %p820_p9 = por %p138_p6, %p50_p1  ;;  %p515_p13 = scmp.lt.s32.totalorder %s737_s17, 2 }
  0x14   : > { %s825_s26 = scalar_select %p41_p7, %s725_s14, %s43_s21  }
  0x15   : > { %p827_p11 = por %p144_p10, %p56_p3  ;;  %s834_s28 = sand.u32 1, %s725_s14  }
  0x16   : > { %965 = sst [smem:[#allocation14_spill]] %s825_s26  ;;  %s468_s29 = sshll.u32 %s834_s28, 3 }
  0x17   : > { %s491_s30 = sshll.u32 %s733_s16, 7  ;;  %p840_p0 = pnand %p515_p13, %p808_p4 }
  0x18   : > { %s186_s5 = sand.u32 1, %s737_s17   ;;  %s968_s1 = sld [smem:[#allocation15_spill]] }
  0x19   : > { %s190_s9 = scalar_lea.vmem [#allocation5], %s468_s29  ;;  %p476_p1 = scmp.ge.s32.totalorder %s737_s17, 1 }
  0x1a   : > { %s198_s10 = sshll.u32 %s190_s9, 4  ;;  %p225_p2 = scmp.lt.s32.totalorder %s737_s17, 3  ;;  %s199_s10 = int_to_ptr.vmem [resolvable:$true] %s198_s10 }
  0x1b   : > { %s854_s11 = scalar_lea.sflag [#allocation6], %s186_s5  ;;  %p571_p3 = pneg %p840_p0 }
  0x1c   : > { %s582_s19 = scalar_lea.vmem %s199_s10, 128  ;;  %s739_s21 = smov [#allocation5]  }
  0x1d   : > { %p583_p4 = scmp.ne.s32.totalorder %s199_s10, %s582_s19  ;;  %s587_s22 = sshll.u32 %s739_s21, 4  ;;  %s588_s22 = int_to_ptr.vmem [resolvable:$false] %s587_s22 }
  0x1e   : > { %s197_s8 = scalar_lea.hbm %s968_s1, %s491_s30  ;;  %s589_s23 = scalar_lea.vmem %s588_s22, 256 }
  0x1f   : > { %p585_p5 = pnand %p583_p4, %p571_p3  ;;  %p590_p7 = scmp.lt.s32.totalorder %s199_s10, %s588_s22 }
  0x20   : > { %p591_p10 = scmp.lt.s32.totalorder %s589_s23, %s582_s19 }
  0x21   : > { %p586_p6 = pneg %p585_p5 }
  0x22   : > { %p592_p13 = por %p591_p10, %p590_p7 }
  0x24   : > { %p593_p12 = pnand %p592_p13, %p586_p6 }
  0x26   : > { %596 = shalt.err (!%p593_p12)
}
  0x27   : > { %s740_s6 = smov 32   ;;  %s741_s5 = smov 2  }
  0x28   : > { %507 = dma.hbm_to_vmem [thread:$0]  (!%p840_p0), %s197_s8, 128, %s199_s10, %s854_s11, %s740_s6, %s740_s6, %s741_s5  }
  0x29   : > { %p868_p4 = pnand %p476_p1, %p225_p2  ;;  %s175_s21 = scalar_lea.hbm %s953_s0, %s491_s30 }
  0x2a   : > { %s168_s22 = scalar_lea.vmem [#allocation2], %s468_s29  ;;  %s474_s1 = sshll.u32 %s834_s28, 1 }
  0x2b   : > { %s176_s23 = sshll.u32 %s168_s22, 4  ;;  %s165_s20 = scalar_lea.sflag [#allocation3], %s834_s28  ;;  %s177_s23 = int_to_ptr.vmem [resolvable:$true] %s176_s23 }
  0x2c   : > { %s610_s26 = scalar_lea.vmem %s177_s23, 128  ;;  %s742_s8 = smov [#allocation2]  }
  0x2d   : > { %p611_p12 = scmp.ne.s32.totalorder %s177_s23, %s610_s26  ;;  %s615_s10 = sshll.u32 %s742_s8, 4  ;;  %s616_s10 = int_to_ptr.vmem [resolvable:$false] %s615_s10 }
  0x2e   : > { %s617_s14 = scalar_lea.vmem %s616_s10, 256  ;;  %p618_p2 = scmp.lt.s32.totalorder %s177_s23, %s616_s10 }
  0x2f   : > { %p613_p5 = pnand %p611_p12, %p571_p3  ;;  %p619_p6 = scmp.lt.s32.totalorder %s617_s14, %s610_s26 }
  0x31   : > { %p614_p1 = pneg %p613_p5  ;;  %p620_p7 = por %p619_p6, %p618_p2 }
  0x33   : > { %p621_p10 = pnand %p620_p7, %p614_p1 }
  0x35   : > { %624 = shalt.err (!%p621_p10)
}
  0x36   : > { %504 = dma.hbm_to_vmem [thread:$0]  (!%p840_p0), %s175_s21, 128, %s177_s23, %s165_s20, %s740_s6, %s740_s6, %s741_s5  }
  0x37   : > { %s475_s28 = sshll.u32 %s733_s16, 5  ;;  %s212_s29 = scalar_lea.vmem [#allocation7], %s474_s1 }
  0x38   : > { %s220_s30 = sshll.u32 %s212_s29, 4  ;;  %s218_s22 = scalar_lea.hbm %s955_s2, %s475_s28  ;;  %s221_s30 = int_to_ptr.vmem [resolvable:$true] %s220_s30 }
  0x39   : > { %s638_s8 = scalar_lea.vmem %s221_s30, 32  ;;  %s743_s14 = smov [#allocation7]  }
  0x3a   : > { %p639_p13 = scmp.ne.s32.totalorder %s221_s30, %s638_s8  ;;  %s643_s26 = sshll.u32 %s743_s14, 4  ;;  %s644_s26 = int_to_ptr.vmem [resolvable:$false] %s643_s26 }
  0x3b   : > { %s645_s10 = scalar_lea.vmem %s644_s26, 64  ;;  %p646_p1 = scmp.lt.s32.totalorder %s221_s30, %s644_s26 }
  0x3c   : > { %p641_p12 = pnand %p639_p13, %p571_p3  ;;  %p647_p2 = scmp.lt.s32.totalorder %s645_s10, %s638_s8 }
  0x3e   : > { %p642_p5 = pneg %p641_p12  ;;  %p648_p6 = por %p647_p2, %p646_p1 }
  0x40   : > { %p649_p7 = pnand %p648_p6, %p642_p5 }
  0x42   : > { %652 = shalt.err (!%p649_p7)
}
  0x43   : > { %510 = dma.hbm_to_vmem [thread:$0]  (!%p840_p0), %s218_s22, 32, %s221_s30, %s854_s11  }
  0x44   : > { %229 = sbr.rel (%p868_p4) target bundleno = 124 (0x7c), region = 32  ;;  %s899_s1 = sand.u32 (!%p868_p4), 1, %s721_s13  }
  0x45   : > { %s477_s20 = sshll.u32 (!%p868_p4), %s899_s1, 3  ;;  %s232_s6 = scalar_lea.sflag (!%p868_p4), [#allocation3], %s899_s1 }
  0x46   : > { %s235_s5 = scalar_lea.vmem (!%p868_p4), [#allocation2], %s477_s20 }
  0x49   : > { %704 = dma.done.wait (%p816_p8), %s232_s6, 128  }
  0x4a   : > { %706 = vsyncadd (%p816_p8), %s232_s6, 4294967168  ;;  %s240_s4 = sand.u32 1, %s796_s18   ;;  %s244_s7 = scalar_lea.vmem [#allocation5], %s477_s20 }
  0x4b   : > { %s241_s11 = scalar_lea.sflag [#allocation6], %s240_s4 }
  0x4c   : > { %708 = dma.done.wait (%p816_p8), %s241_s11, 160  }
  0x4d   : > { %710 = vsyncadd (%p816_p8), %s241_s11, 4294967136  ;;  %v286_v0 = vld [vmem:[%s235_s5] sm:$0x3]  ;;  %v287_v1 = vld [vmem:[%s244_s7] sm:$0x3]  ;;  %s479_s18 = sshll.u32 %s899_s1, 1 }
  0x4e   : > { %v481_v2 = vld [vmem:[%s235_s5 + $0x2] sm:$0x3]  ;;  %v288_v3 = vsub.f32 %v286_v0, %v287_v1  ;;  %v482_v4 = vld [vmem:[%s244_s7 + $0x2] sm:$0x3]  ;;  %v483_v5 = vld [vmem:[%s235_s5 + $0x4] sm:$0x3] }
  0x4f   : > { %v484_v6 = vld [vmem:[%s244_s7 + $0x4] sm:$0x3]  ;;  %v294_v7 = vsub.f32 %v481_v2, %v482_v4  ;;  %v485_v9 = vld [vmem:[%s235_s5 + $0x6] sm:$0x3]  ;;  %v486_v10 = vld [vmem:[%s244_s7 + $0x6] sm:$0x3] }
  0x50   : > { %v301_v8 = vsub.f32 %v483_v5, %v484_v6  ;;  %v289_v11 = vmul.f32 %v288_v3, %v288_v3  ;;  %v308_v12 = vsub.f32 %v485_v9, %v486_v10  ;;  %s253_s24 = scalar_lea.vmem [#allocation7], %s479_s18  ;;  %s285_s21 = scalar_lea.vmem [#allocation8], %s479_s18 }
  0x51   : > { %v295_v13 = vmul.f32 %v294_v7, %v294_v7  ;;  %v319_v23 = vld [vmem:[%s253_s24] sm:$0x3]  ;;  %s337_s23 = sshll.u32 %s285_s21, 4  ;;  %s488_s28 = sshll.u32 %s729_s15, 5  ;;  %s338_s23 = int_to_ptr.vmem [resolvable:$true] %s337_s23 }
  0x52   : > { %v302_v14 = vmul.f32 %v301_v8, %v301_v8  ;;  %v309_v16 = vmul.f32 %v308_v12, %v308_v12  ;;  %s335_s9 = scalar_lea.hbm %s956_s3, %s488_s28  ;;  %s323_s19 = scalar_lea.sflag [#allocation4], %s899_s1 }
  0x53   : > { %v296_v15 = vadd.f32 %v295_v13, %v289_v11  ;;  %s653_s22 = scalar_lea.vmem %s338_s23, 32  ;;  %s744_s8 = smov [#allocation8]  }
  0x54   : > { %p654_p8 = scmp.ne.s32.totalorder %s338_s23, %s653_s22  ;;  %s657_s14 = sshll.u32 %s744_s8, 4  ;;  %s658_s14 = int_to_ptr.vmem [resolvable:$false] %s657_s14 }
  0x55   : > { %v303_v17 = vadd.f32 %v302_v14, %v296_v15  ;;  %s659_s26 = scalar_lea.vmem %s658_s14, 64  ;;  %p660_p4 = scmp.lt.s32.totalorder %s338_s23, %s658_s14 }
  0x56   : > { %p655_p0 = pnand %p654_p8, %p820_p9  ;;  %p661_p10 = scmp.lt.s32.totalorder %s659_s26, %s653_s22 }
  0x57   : > { %v310_v18 = vadd.f32 %v309_v16, %v303_v17 }
  0x58   : > { %p656_p3 = pneg %p655_p0  ;;  %p662_p13 = por %p661_p10, %p660_p4 }
  0x59   : > { %v311_v19 = vadd.f32 1e-06, %v310_v18 }
  0x5a   : > { %p663_p12 = pnand %p662_p13, %p656_p3 }
  0x5b   : > { %567 = vrsqrt.f32 %v311_v19  ;;  %vm314_vm0 = vcmp.eq.f32.partialorder %v311_v19, inf  ;;  %v317_v21 = vand.u32 2147483648, %v311_v19  ;;  %vm316_vm1 = vcmp.eq.f32.partialorder %v311_v19, 0.0 }
  0x68   : > { %v568_v20 = vpop.eup %567 }
  0x69   : > { %v313_v22 = vmul.f32 %v568_v20, %v311_v19 }
  0x6b   : > { %v315_v24 = vsel %vm314_vm0, %v311_v19, %v313_v22 }
  0x6c   : > { %v318_v25 = vsel %vm316_vm1, %v317_v21, %v315_v24 }
  0x6d   : > { %v320_v26 = vmul.f32 %v319_v23, %v318_v25 }
  0x6f   : > { %321 = vst [vmem:[%s285_s21] sm:$0x3] %v320_v26 }
  0x70   : > { %666 = shalt.err (!%p663_p12)
}
  0x71   : > { %s667_s15 = scalar_lea.hbm %s335_s9, 32  ;;  %s671_s20 = scalar_lea.hbm %s956_s3, 64 }
  0x72   : > { %p668_p5 = scmp.ne.s32.totalorder %s335_s9, %s667_s15  ;;  %p672_p6 = scmp.lt.s32.totalorder %s335_s9, %s956_s3 }
  0x73   : > { %p673_p7 = scmp.lt.s32.totalorder %s671_s20, %s667_s15 }
  0x74   : > { %p669_p1 = pnand %p668_p5, %p820_p9 }
  0x75   : > { %p674_p8 = por %p673_p7, %p672_p6 }
  0x76   : > { %p670_p2 = pneg %p669_p1 }
  0x78   : > { %p675_p0 = pnand %p674_p8, %p670_p2 }
  0x7a   : > { %678 = shalt.err (!%p675_p0)
}
  0x7b   : > { %499 = dma.vmem_to_hbm [thread:$0]  (%p820_p9), %s338_s23, 32, %s335_s9, %s323_s19  }
  0x7c PF: > { %s349_s4 = sand.u32 1, %s717_s12   ;;  %p970_p3 = scmp.ge.s32.totalorder %s737_s17, 2 }
  0x7d   : > { %s350_s11 = scalar_lea.sflag [#allocation4], %s349_s4 }
  0x7e   : > { %p512_p4 = pnand %p970_p3, %p827_p11 }
  0x80   : > { %p513_p10 = pneg %p512_p4 }
  0x82   : > { %712 = dma.done.wait (%p513_p10), %s350_s11, 32  }
  0x83   : > { %714 = vsyncadd (%p513_p10), %s350_s11, 4294967264  ;;  %s22_s17 = sadd.s32 1, %s737_s17   ;;  %s971_s7 = sld [smem:[#allocation12_spill]] }
  0x84   : > { %p19_p13 = scmp.ge.s32.totalorder %s22_s17, 4   ;;  %s972_s14 = sld [smem:[#allocation14_spill]] }
  0x85   : > { %s973_s25 = sld [smem:[#allocation13_spill]]  ;;  %s974_s12 = smov %s721_s13 }
  0x86   : > { %s976_s15 = smov %s733_s16 }
  0x87   :  { %21 = sbr.rel (!%p19_p13) target bundleno = 10 (0xa), region = 107 }
  0x89   : > { %s975_s13 = smov %s971_s7 }
  0x8b   : > { %s977_s16 = smov %s973_s25 }
  0x8c   :  { %355 = vsyncpa [#allocation3], 1 }
  0x8d   :  { %357 = vsyncpa [#allocation3 + $0x1], 1 }
  0x8e   :  { %358 = vsyncpa [#allocation6], 1 }
  0x8f   :  { %360 = vsyncpa [#allocation6 + $0x1], 1 }
  0x90   :  { %361 = vsyncpa [#allocation4], 1 }
  0x91   :  { %363 = vsyncpa [#allocation4 + $0x1], 1 }

</bundles_post_ra>
